<compile_context>
chip_gen: v7x
topology: tpu7x:2x2x1
jax: 0.10.0
libtpu: 0.0.40
codegen_flags: <defaults>
</compile_context>

<pallas_src>
import numpy as np

import jax
import jax.numpy as jnp
from jax import lax
from jax.experimental import pallas as pl
from jax.experimental.pallas import tpu as pltpu

BN_EPS = 1e-5
LANE = 128

# (name, kind, Ci, Co) -- static layer table (channel sizes must stay static).
LAYERS = (("enc1", "conv", 3, 12), ("enc2", "conv", 12, 24), ("enc3", "conv", 24, 48),
          ("dec1", "convT", 48, 24), ("dec2", "convT", 24, 12), ("dec3", "convT", 12, 3))


def _round_up(x, m):
    return ((x + m - 1) // m) * m


def _pick_batch_block(n):
    """Images per grid step: largest divisor of n that keeps >=2 grid steps
    (v7x has 2 TensorCores) and a bounded per-step VMEM footprint."""
    if n <= 2:
        return 1
    best = 1
    for b in range(1, min(n // 2, 16) + 1):
        if n % b == 0:
            best = b
    return best


# ----------------------------------------------------------------------------
# Pallas kernel: one lane-dense matmul per batch-block + BN partial sums
# ----------------------------------------------------------------------------
def _conv_stats_kernel(x_ref, w_ref, y_ref, s1_ref, s2_ref):
    # x_ref:  (1, R, Kp)   bf16  im2col slab (tap-concatenated, lane-padded)
    # w_ref:  (Kp, 128)    bf16  tap-concatenated weight, zero-padded, resident
    # y_ref:  (1, R, 128)  bf16  raw (pre-BN) conv output, lane-dense store
    # s1/s2:  (1, 1, 128)  f32   per-block sum / sum-of-squares (global BN stats)
    x = x_ref[0]                                                   # (R, Kp)
    acc = jnp.dot(x, w_ref[...], preferred_element_type=jnp.float32)
    y_ref[0] = acc.astype(y_ref.dtype)
    s1_ref[0] = jnp.sum(acc, axis=0, keepdims=True)
    s2_ref[0] = jnp.sum(acc * acc, axis=0, keepdims=True)


def _matmul_stats(slab, w_pad):
    """slab: (N, rows, Kp) bf16 -> y (N, rows, 128) bf16, s1/s2 (128,) f32."""
    n, rows, kp = slab.shape
    lanes = w_pad.shape[1]
    b = _pick_batch_block(n)
    nb = n // b
    r = b * rows                                    # B images folded into M dim
    slab = slab.reshape(nb, r, kp)
    y, s1, s2 = pl.pallas_call(
        _conv_stats_kernel,
        grid=(nb,),
        in_specs=[
            pl.BlockSpec((1, r, kp), lambda i: (i, 0, 0)),
            pl.BlockSpec((kp, lanes), lambda i: (0, 0)),          # resident weight
        ],
        out_specs=[
            pl.BlockSpec((1, r, lanes), lambda i: (i, 0, 0)),
            pl.BlockSpec((1, 1, lanes), lambda i: (i, 0, 0)),
            pl.BlockSpec((1, 1, lanes), lambda i: (i, 0, 0)),
        ],
        out_shape=[
            jax.ShapeDtypeStruct((nb, r, lanes), jnp.bfloat16),
            jax.ShapeDtypeStruct((nb, 1, lanes), jnp.float32),
            jax.ShapeDtypeStruct((nb, 1, lanes), jnp.float32),
        ],
        compiler_params=pltpu.CompilerParams(
            dimension_semantics=("parallel",)),
    )(slab, w_pad)
    return (y.reshape(n, rows, lanes),
            jnp.sum(s1, axis=0)[0],                 # (128,)
            jnp.sum(s2, axis=0)[0])


def _bn_scale_shift(ssum, ssq, count, gamma, beta):
    """Exact training-mode BN (biased variance) from global sum / sum-of-squares."""
    mean = ssum / count
    var = jnp.maximum(ssq / count - mean * mean, 0.0)
    scale = gamma * lax.rsqrt(var + BN_EPS)
    shift = beta - mean * scale
    return scale, shift


# ----------------------------------------------------------------------------
# Layer wrappers (layout glue + BN/act epilogue fuse in XLA around the kernel)
# ----------------------------------------------------------------------------
def _conv_bn_relu(x, w_pad, ci, co, gamma, beta):
    """Conv2d(ci->co, k=4, s=2, p=1) + BatchNorm(train) + ReLU.  x: NHWC f32."""
    n, h, w, _ = x.shape
    ho, wo = h // 2, w // 2
    rows = ho * wo
    kp = w_pad.shape[0]
    xpad = jnp.pad(x, ((0, 0), (1, 1), (1, 1), (0, 0)))
    # 16 tap windows, concatenated on the contracting dim (channel-fastest).
    wins = [xpad[:, a:a + 2 * ho - 1:2, b:b + 2 * wo - 1:2, :]
            for a in range(4) for b in range(4)]
    slab = jnp.concatenate(wins, axis=-1).reshape(n, rows, 16 * ci)
    slab = jnp.pad(slab, ((0, 0), (0, 0), (0, kp - 16 * ci))).astype(jnp.bfloat16)

    y, s1, s2 = _matmul_stats(slab, w_pad)
    scale, shift = _bn_scale_shift(s1[:co], s2[:co], n * rows, gamma, beta)
    z = y[:, :, :co].astype(jnp.float32) * scale + shift
    z = jnp.maximum(z, 0.0)
    return z.reshape(n, ho, wo, co)


def _convT_bn_act(x, w_pad, ci, co, gamma, beta, act):
    """ConvTranspose2d(ci->co, k=4, s=2, p=1) + BatchNorm(train) + act.  x: NHWC f32.
    Sub-pixel decomposition: the 9 shared 3x3 windows feed all 4 output phases
    via one structural-zero matmul; phases sit side by side in the lane dim."""
    n, h, w, _ = x.shape
    rows = h * w
    kp = w_pad.shape[0]
    xpad = jnp.pad(x, ((0, 0), (1, 1), (1, 1), (0, 0)))
    wins = [xpad[:, i:i + h, j:j + w, :] for i in range(3) for j in range(3)]
    slab = jnp.concatenate(wins, axis=-1).reshape(n, rows, 9 * ci)
    slab = jnp.pad(slab, ((0, 0), (0, 0), (0, kp - 9 * ci))).astype(jnp.bfloat16)

    y, s1, s2 = _matmul_stats(slab, w_pad)
    ssum = s1[:4 * co].reshape(4, co).sum(axis=0)     # fold the 4 phase copies
    ssq = s2[:4 * co].reshape(4, co).sum(axis=0)
    scale, shift = _bn_scale_shift(ssum, ssq, n * 4 * rows, gamma, beta)

    z = y[:, :, :4 * co].astype(jnp.float32).reshape(n, h, w, 2, 2, co)
    z = z * scale + shift
    z = jnp.maximum(z, 0.0) if act == "relu" else jnp.tanh(z)
    # depth-to-space: out[n, 2u+r, 2v+t, c] = z[n, u, v, r, t, c]
    return z.transpose(0, 1, 3, 2, 4, 5).reshape(n, 2 * h, 2 * w, co)


# ----------------------------------------------------------------------------
# Parameter init (PyTorch layouts) and one-time weight preparation
# ----------------------------------------------------------------------------
def init_params(key):
    params = {}
    keys = jax.random.split(key, len(LAYERS))
    for (name, kind, ci, co), k in zip(LAYERS, keys):
        kw, kb = jax.random.split(k)
        wshape = (co, ci, 4, 4) if kind == "conv" else (ci, co, 4, 4)
        params[name] = {
            "w": 0.05 * jax.random.normal(kw, wshape, jnp.float32),
            # Bias is part of the PyTorch module but has no effect: a constant
            # per-channel shift before training-mode BN is cancelled exactly.
            "b": 0.05 * jax.random.normal(kb, (co,), jnp.float32),
            "gamma": jnp.ones((co,), jnp.float32),
            "beta": jnp.zeros((co,), jnp.float32),
        }
    return params


def _prep_conv_weight(w):
    """Conv2d weight (Co, Ci, 4, 4) -> (Kp, 128) bf16; row = (a*4+b)*Ci + ci."""
    co, ci = w.shape[0], w.shape[1]
    w2 = np.asarray(w).transpose(2, 3, 1, 0).reshape(16 * ci, co)
    kp = _round_up(16 * ci, LANE)
    wp = np.zeros((kp, LANE), np.float32)
    wp[:16 * ci, :co] = w2
    return jnp.asarray(wp, dtype=jnp.bfloat16)


def _prep_convT_weight(wt):
    """ConvTranspose2d weight (Ci, Co, 4, 4) -> 9-window x 4-phase (Kp, 128) bf16
    with structural zeros.  Row = (i*3+j)*Ci + ci for padded-input window (i, j);
    col = (r*2+t)*Co + co for output phase (r, t).  Phase (r, t) at out (2u+r,
    2v+t) reads window (i, j) = (r+d, t+e) with kernel tap (3-r-2d, 3-t-2e)."""
    ci, co = wt.shape[0], wt.shape[1]
    wt_np = np.asarray(wt)
    kp = _round_up(9 * ci, LANE)
    wp = np.zeros((kp, LANE), np.float32)
    for r in range(2):
        for t in range(2):
            for d in range(2):
                for e in range(2):
                    i, j = r + d, t + e
                    wp[(i * 3 + j) * ci:(i * 3 + j + 1) * ci,
                       (r * 2 + t) * co:(r * 2 + t + 1) * co] = \
                        wt_np[:, :, 3 - r - 2 * d, 3 - t - 2 * e]
    return jnp.asarray(wp, dtype=jnp.bfloat16)


def prepare_params(params):
    """One-time weight transforms hoisted out of the forward pass."""
    prep = {}
    for name, kind, _, _ in LAYERS:
        p = params[name]
        wk = _prep_conv_weight(p["w"]) if kind == "conv" else _prep_convT_weight(p["w"])
        prep[name] = (wk, p["gamma"], p["beta"])
    return prep


# ----------------------------------------------------------------------------
# Forward pass (matches conv_autoencoder.forward in training mode)
# ----------------------------------------------------------------------------
def conv_autoencoder_forward(prepared, x_nchw):
    x = x_nchw.transpose(0, 2, 3, 1)                  # NCHW -> NHWC once
    for name, kind, ci, co in LAYERS:
        wk, gamma, beta = prepared[name]
        if kind == "conv":
            x = _conv_bn_relu(x, wk, ci, co, gamma, beta)
        else:
            act = "tanh" if name == "dec3" else "relu"
            x = _convT_bn_act(x, wk, ci, co, gamma, beta, act)
    return x.transpose(0, 3, 1, 2)                    # NHWC -> NCHW at the boundary


# ----------------------------------------------------------------------------
# Pure-XLA reference with the same dtype policy (bf16 operands, f32 accumulate)
# ----------------------------------------------------------------------------
def _ref_forward(params, x_nchw):
    def bn_act(y, gamma, beta, act):
        mean = jnp.mean(y, axis=(0, 1, 2))
        var = jnp.maximum(jnp.mean(y * y, axis=(0, 1, 2)) - mean * mean, 0.0)
        scale = gamma * lax.rsqrt(var + BN_EPS)
        shift = beta - mean * scale
        z = y.astype(jnp.bfloat16).astype(jnp.float32) * scale + shift
        return jnp.maximum(z, 0.0) if act == "relu" else jnp.tanh(z)

    x = x_nchw.transpose(0, 2, 3, 1)
    for name, kind, _, _ in LAYERS:
        p = params[name]
        xb = x.astype(jnp.bfloat16)
        if kind == "conv":
            wk = p["w"].transpose(2, 3, 1, 0).astype(jnp.bfloat16)      # HWIO
            y = lax.conv_general_dilated(
                xb, wk, (2, 2), ((1, 1), (1, 1)),
                dimension_numbers=("NHWC", "HWIO", "NHWC"),
                preferred_element_type=jnp.float32)
        else:
            # ConvTranspose2d == conv on the lhs-dilated input with the spatially
            # flipped kernel and padding k-1-p = 2.
            wk = p["w"][:, :, ::-1, ::-1].transpose(2, 3, 0, 1).astype(jnp.bfloat16)
            y = lax.conv_general_dilated(
                xb, wk, (1, 1), ((2, 2), (2, 2)), lhs_dilation=(2, 2),
                dimension_numbers=("NHWC", "HWIO", "NHWC"),
                preferred_element_type=jnp.float32)
        x = bn_act(y, p["gamma"], p["beta"], "tanh" if name == "dec3" else "relu")
    return x.transpose(0, 3, 1, 2)


if __name__ == "__main__":
    key = jax.random.PRNGKey(0)
    k_params, k_x = jax.random.split(key)
    params = init_params(k_params)
    prepared = prepare_params(params)

    # NCHW input, 3 channels, 16x16 (16 -> 8 -> 4 -> 2 -> 4 -> 8 -> 16)
    x = jax.random.normal(k_x, (2, 3, 16, 16), jnp.float32)

    fwd = jax.jit(conv_autoencoder_forward)
    y = fwd(prepared, x)
    jax.block_until_ready(y)

    assert y.shape == (2, 3, 16, 16), y.shape
    assert bool(jnp.all(jnp.isfinite(y)))

    # Self-check against the XLA reference (same bf16/f32 policy): layout bugs
    # would show up as O(1) differences; numerics stay well below this bound.
    y_ref = jax.jit(_ref_forward)(params, x)
    err = float(jnp.max(jnp.abs(y - y_ref)))
    assert err < 3e-2, f"max abs diff vs reference: {err}"

    print("KERNEL_OK")
</pallas_src>

<mosaic_0001>
module attributes {stable_mosaic.version = 11 : i64} {
  func.func @_conv_stats_kernel(%arg0: i32, %arg1: memref<1x64x128xbf16, #tpu.memory_space<vmem>>, %arg2: memref<128x128xbf16, #tpu.memory_space<vmem>>, %arg3: memref<1x64x128xbf16, #tpu.memory_space<vmem>>, %arg4: memref<1x1x128xf32, #tpu.memory_space<vmem>>, %arg5: memref<1x1x128xf32, #tpu.memory_space<vmem>>) attributes {dimension_semantics = [#tpu.dimension_semantics<parallel>], iteration_bounds = array<i64: 2>, scalar_prefetch = 0 : i64, scratch_operands = 0 : i64, tpu.core_type = #tpu.core_type<tc>, window_params = [{transform_indices = @transform_0, window_bounds = array<i64: 1, 64, 128>}, {pipeline_mode = #tpu.pipeline_mode<synchronous>, transform_indices = @transform_1, window_bounds = array<i64: 128, 128>}, {transform_indices = @transform_2, window_bounds = array<i64: 1, 64, 128>}, {transform_indices = @transform_3, window_bounds = array<i64: 1, 1, 128>}, {transform_indices = @transform_4, window_bounds = array<i64: 1, 1, 128>}]} {
    %c0 = arith.constant 0 : index
    %c0_0 = arith.constant 0 : index
    %c0_1 = arith.constant 0 : index
    %0 = vector.load %arg1[%c0, %c0_0, %c0_1] : memref<1x64x128xbf16, #tpu.memory_space<vmem>>, vector<1x64x128xbf16>
    %1 = vector.shape_cast %0 : vector<1x64x128xbf16> to vector<64x128xbf16>
    %c0_2 = arith.constant 0 : index
    %c0_3 = arith.constant 0 : index
    %2 = vector.load %arg2[%c0_2, %c0_3] : memref<128x128xbf16, #tpu.memory_space<vmem>>, vector<128x128xbf16>
    %cst = arith.constant dense<0.000000e+00> : vector<64x128xf32>
    %3 = tpu.matmul %1, %2, %cst {dimension_numbers = #tpu.dot_dimension_numbers<[1], [0], [0], [1], [0, 0, 1, 1], [], []>} : vector<64x128xbf16>, vector<128x128xbf16>, vector<64x128xf32> -> vector<64x128xf32>
    %4 = arith.truncf %3 : vector<64x128xf32> to vector<64x128xbf16>
    %c0_4 = arith.constant 0 : index
    %c0_5 = arith.constant 0 : index
    %c0_6 = arith.constant 0 : index
    %5 = vector.load %arg3[%c0_4, %c0_5, %c0_6] : memref<1x64x128xbf16, #tpu.memory_space<vmem>>, vector<1x64x128xbf16>
    %6 = vector.shape_cast %5 : vector<1x64x128xbf16> to vector<64x128xbf16>
    %7 = vector.shape_cast %4 : vector<64x128xbf16> to vector<1x64x128xbf16>
    tpu.vector_store %arg3[%c0_4, %c0_5, %c0_6], %7 {strides = array<i32>} : memref<1x64x128xbf16, #tpu.memory_space<vmem>>, vector<1x64x128xbf16>,
    %cst_7 = arith.constant dense<0.000000e+00> : vector<128xf32>
    %8 = vector.multi_reduction <add>, %3, %cst_7 [0] : vector<64x128xf32> to vector<128xf32>
    %9 = vector.shape_cast %8 : vector<128xf32> to vector<1x128xf32>
    %c0_8 = arith.constant 0 : index
    %c0_9 = arith.constant 0 : index
    %c0_10 = arith.constant 0 : index
    %10 = vector.load %arg4[%c0_8, %c0_9, %c0_10] : memref<1x1x128xf32, #tpu.memory_space<vmem>>, vector<1x1x128xf32>
    %11 = vector.shape_cast %10 : vector<1x1x128xf32> to vector<1x128xf32>
    %12 = vector.shape_cast %9 : vector<1x128xf32> to vector<1x1x128xf32>
    tpu.vector_store %arg4[%c0_8, %c0_9, %c0_10], %12 {strides = array<i32>} : memref<1x1x128xf32, #tpu.memory_space<vmem>>, vector<1x1x128xf32>,
    %13 = arith.mulf %3, %3 : vector<64x128xf32>
    %cst_11 = arith.constant dense<0.000000e+00> : vector<128xf32>
    %14 = vector.multi_reduction <add>, %13, %cst_11 [0] : vector<64x128xf32> to vector<128xf32>
    %15 = vector.shape_cast %14 : vector<128xf32> to vector<1x128xf32>
    %c0_12 = arith.constant 0 : index
    %c0_13 = arith.constant 0 : index
    %c0_14 = arith.constant 0 : index
    %16 = vector.load %arg5[%c0_12, %c0_13, %c0_14] : memref<1x1x128xf32, #tpu.memory_space<vmem>>, vector<1x1x128xf32>
    %17 = vector.shape_cast %16 : vector<1x1x128xf32> to vector<1x128xf32>
    %18 = vector.shape_cast %15 : vector<1x128xf32> to vector<1x1x128xf32>
    tpu.vector_store %arg5[%c0_12, %c0_13, %c0_14], %18 {strides = array<i32>} : memref<1x1x128xf32, #tpu.memory_space<vmem>>, vector<1x1x128xf32>,
    return
  }
  func.func @transform_0(%arg0: i32) -> (i32, i32, i32) {
    %c0_i32 = arith.constant 0 : i32
    %c0_i32_0 = arith.constant 0 : i32
    %c0_i32_1 = arith.constant 0 : i32
    return %arg0, %c0_i32, %c0_i32_0 : i32, i32, i32
  }
  func.func @transform_1(%arg0: i32) -> (i32, i32) {
    %c0_i32 = arith.constant 0 : i32
    %c0_i32_0 = arith.constant 0 : i32
    %c0_i32_1 = arith.constant 0 : i32
    return %c0_i32, %c0_i32_0 : i32, i32
  }
  func.func @transform_2(%arg0: i32) -> (i32, i32, i32) {
    %c0_i32 = arith.constant 0 : i32
    %c0_i32_0 = arith.constant 0 : i32
    %c0_i32_1 = arith.constant 0 : i32
    return %arg0, %c0_i32, %c0_i32_0 : i32, i32, i32
  }
  func.func @transform_3(%arg0: i32) -> (i32, i32, i32) {
    %c0_i32 = arith.constant 0 : i32
    %c0_i32_0 = arith.constant 0 : i32
    %c0_i32_1 = arith.constant 0 : i32
    return %arg0, %c0_i32, %c0_i32_0 : i32, i32, i32
  }
  func.func @transform_4(%arg0: i32) -> (i32, i32, i32) {
    %c0_i32 = arith.constant 0 : i32
    %c0_i32_0 = arith.constant 0 : i32
    %c0_i32_1 = arith.constant 0 : i32
    return %arg0, %c0_i32, %c0_i32_0 : i32, i32, i32
  }
}

module attributes {stable_mosaic.version = 11 : i64} {
  func.func @_conv_stats_kernel(%arg0: i32, %arg1: memref<1x16x256xbf16, #tpu.memory_space<vmem>>, %arg2: memref<256x128xbf16, #tpu.memory_space<vmem>>, %arg3: memref<1x16x128xbf16, #tpu.memory_space<vmem>>, %arg4: memref<1x1x128xf32, #tpu.memory_space<vmem>>, %arg5: memref<1x1x128xf32, #tpu.memory_space<vmem>>) attributes {dimension_semantics = [#tpu.dimension_semantics<parallel>], iteration_bounds = array<i64: 2>, scalar_prefetch = 0 : i64, scratch_operands = 0 : i64, tpu.core_type = #tpu.core_type<tc>, window_params = [{transform_indices = @transform_0, window_bounds = array<i64: 1, 16, 256>}, {pipeline_mode = #tpu.pipeline_mode<synchronous>, transform_indices = @transform_1, window_bounds = array<i64: 256, 128>}, {transform_indices = @transform_2, window_bounds = array<i64: 1, 16, 128>}, {transform_indices = @transform_3, window_bounds = array<i64: 1, 1, 128>}, {transform_indices = @transform_4, window_bounds = array<i64: 1, 1, 128>}]} {
    %c0 = arith.constant 0 : index
    %c0_0 = arith.constant 0 : index
    %c0_1 = arith.constant 0 : index
    %0 = vector.load %arg1[%c0, %c0_0, %c0_1] : memref<1x16x256xbf16, #tpu.memory_space<vmem>>, vector<1x16x256xbf16>
    %1 = vector.shape_cast %0 : vector<1x16x256xbf16> to vector<16x256xbf16>
    %c0_2 = arith.constant 0 : index
    %c0_3 = arith.constant 0 : index
    %2 = vector.load %arg2[%c0_2, %c0_3] : memref<256x128xbf16, #tpu.memory_space<vmem>>, vector<256x128xbf16>
    %cst = arith.constant dense<0.000000e+00> : vector<16x128xf32>
    %3 = tpu.matmul %1, %2, %cst {dimension_numbers = #tpu.dot_dimension_numbers<[1], [0], [0], [1], [0, 0, 1, 1], [], []>} : vector<16x256xbf16>, vector<256x128xbf16>, vector<16x128xf32> -> vector<16x128xf32>
    %4 = arith.truncf %3 : vector<16x128xf32> to vector<16x128xbf16>
    %c0_4 = arith.constant 0 : index
    %c0_5 = arith.constant 0 : index
    %c0_6 = arith.constant 0 : index
    %5 = vector.load %arg3[%c0_4, %c0_5, %c0_6] : memref<1x16x128xbf16, #tpu.memory_space<vmem>>, vector<1x16x128xbf16>
    %6 = vector.shape_cast %5 : vector<1x16x128xbf16> to vector<16x128xbf16>
    %7 = vector.shape_cast %4 : vector<16x128xbf16> to vector<1x16x128xbf16>
    tpu.vector_store %arg3[%c0_4, %c0_5, %c0_6], %7 {strides = array<i32>} : memref<1x16x128xbf16, #tpu.memory_space<vmem>>, vector<1x16x128xbf16>,
    %cst_7 = arith.constant dense<0.000000e+00> : vector<128xf32>
    %8 = vector.multi_reduction <add>, %3, %cst_7 [0] : vector<16x128xf32> to vector<128xf32>
    %9 = vector.shape_cast %8 : vector<128xf32> to vector<1x128xf32>
    %c0_8 = arith.constant 0 : index
    %c0_9 = arith.constant 0 : index
    %c0_10 = arith.constant 0 : index
    %10 = vector.load %arg4[%c0_8, %c0_9, %c0_10] : memref<1x1x128xf32, #tpu.memory_space<vmem>>, vector<1x1x128xf32>
    %11 = vector.shape_cast %10 : vector<1x1x128xf32> to vector<1x128xf32>
    %12 = vector.shape_cast %9 : vector<1x128xf32> to vector<1x1x128xf32>
    tpu.vector_store %arg4[%c0_8, %c0_9, %c0_10], %12 {strides = array<i32>} : memref<1x1x128xf32, #tpu.memory_space<vmem>>, vector<1x1x128xf32>,
    %13 = arith.mulf %3, %3 : vector<16x128xf32>
    %cst_11 = arith.constant dense<0.000000e+00> : vector<128xf32>
    %14 = vector.multi_reduction <add>, %13, %cst_11 [0] : vector<16x128xf32> to vector<128xf32>
    %15 = vector.shape_cast %14 : vector<128xf32> to vector<1x128xf32>
    %c0_12 = arith.constant 0 : index
    %c0_13 = arith.constant 0 : index
    %c0_14 = arith.constant 0 : index
    %16 = vector.load %arg5[%c0_12, %c0_13, %c0_14] : memref<1x1x128xf32, #tpu.memory_space<vmem>>, vector<1x1x128xf32>
    %17 = vector.shape_cast %16 : vector<1x1x128xf32> to vector<1x128xf32>
    %18 = vector.shape_cast %15 : vector<1x128xf32> to vector<1x1x128xf32>
    tpu.vector_store %arg5[%c0_12, %c0_13, %c0_14], %18 {strides = array<i32>} : memref<1x1x128xf32, #tpu.memory_space<vmem>>, vector<1x1x128xf32>,
    return
  }
  func.func @transform_0(%arg0: i32) -> (i32, i32, i32) {
    %c0_i32 = arith.constant 0 : i32
    %c0_i32_0 = arith.constant 0 : i32
    %c0_i32_1 = arith.constant 0 : i32
    return %arg0, %c0_i32, %c0_i32_0 : i32, i32, i32
  }
  func.func @transform_1(%arg0: i32) -> (i32, i32) {
    %c0_i32 = arith.constant 0 : i32
    %c0_i32_0 = arith.constant 0 : i32
    %c0_i32_1 = arith.constant 0 : i32
    return %c0_i32, %c0_i32_0 : i32, i32
  }
  func.func @transform_2(%arg0: i32) -> (i32, i32, i32) {
    %c0_i32 = arith.constant 0 : i32
    %c0_i32_0 = arith.constant 0 : i32
    %c0_i32_1 = arith.constant 0 : i32
    return %arg0, %c0_i32, %c0_i32_0 : i32, i32, i32
  }
  func.func @transform_3(%arg0: i32) -> (i32, i32, i32) {
    %c0_i32 = arith.constant 0 : i32
    %c0_i32_0 = arith.constant 0 : i32
    %c0_i32_1 = arith.constant 0 : i32
    return %arg0, %c0_i32, %c0_i32_0 : i32, i32, i32
  }
  func.func @transform_4(%arg0: i32) -> (i32, i32, i32) {
    %c0_i32 = arith.constant 0 : i32
    %c0_i32_0 = arith.constant 0 : i32
    %c0_i32_1 = arith.constant 0 : i32
    return %arg0, %c0_i32, %c0_i32_0 : i32, i32, i32
  }
}

module attributes {stable_mosaic.version = 11 : i64} {
  func.func @_conv_stats_kernel(%arg0: i32, %arg1: memref<1x4x384xbf16, #tpu.memory_space<vmem>>, %arg2: memref<384x128xbf16, #tpu.memory_space<vmem>>, %arg3: memref<1x4x128xbf16, #tpu.memory_space<vmem>>, %arg4: memref<1x1x128xf32, #tpu.memory_space<vmem>>, %arg5: memref<1x1x128xf32, #tpu.memory_space<vmem>>) attributes {dimension_semantics = [#tpu.dimension_semantics<parallel>], iteration_bounds = array<i64: 2>, scalar_prefetch = 0 : i64, scratch_operands = 0 : i64, tpu.core_type = #tpu.core_type<tc>, window_params = [{transform_indices = @transform_0, window_bounds = array<i64: 1, 4, 384>}, {pipeline_mode = #tpu.pipeline_mode<synchronous>, transform_indices = @transform_1, window_bounds = array<i64: 384, 128>}, {transform_indices = @transform_2, window_bounds = array<i64: 1, 4, 128>}, {transform_indices = @transform_3, window_bounds = array<i64: 1, 1, 128>}, {transform_indices = @transform_4, window_bounds = array<i64: 1, 1, 128>}]} {
    %c0 = arith.constant 0 : index
    %c0_0 = arith.constant 0 : index
    %c0_1 = arith.constant 0 : index
    %0 = vector.load %arg1[%c0, %c0_0, %c0_1] : memref<1x4x384xbf16, #tpu.memory_space<vmem>>, vector<1x4x384xbf16>
    %1 = vector.shape_cast %0 : vector<1x4x384xbf16> to vector<4x384xbf16>
    %c0_2 = arith.constant 0 : index
    %c0_3 = arith.constant 0 : index
    %2 = vector.load %arg2[%c0_2, %c0_3] : memref<384x128xbf16, #tpu.memory_space<vmem>>, vector<384x128xbf16>
    %cst = arith.constant dense<0.000000e+00> : vector<4x128xf32>
    %3 = tpu.matmul %1, %2, %cst {dimension_numbers = #tpu.dot_dimension_numbers<[1], [0], [0], [1], [0, 0, 1, 1], [], []>} : vector<4x384xbf16>, vector<384x128xbf16>, vector<4x128xf32> -> vector<4x128xf32>
    %4 = arith.truncf %3 : vector<4x128xf32> to vector<4x128xbf16>
    %c0_4 = arith.constant 0 : index
    %c0_5 = arith.constant 0 : index
    %c0_6 = arith.constant 0 : index
    %5 = vector.load %arg3[%c0_4, %c0_5, %c0_6] : memref<1x4x128xbf16, #tpu.memory_space<vmem>>, vector<1x4x128xbf16>
    %6 = vector.shape_cast %5 : vector<1x4x128xbf16> to vector<4x128xbf16>
    %7 = vector.shape_cast %4 : vector<4x128xbf16> to vector<1x4x128xbf16>
    tpu.vector_store %arg3[%c0_4, %c0_5, %c0_6], %7 {strides = array<i32>} : memref<1x4x128xbf16, #tpu.memory_space<vmem>>, vector<1x4x128xbf16>,
    %cst_7 = arith.constant dense<0.000000e+00> : vector<128xf32>
    %8 = vector.multi_reduction <add>, %3, %cst_7 [0] : vector<4x128xf32> to vector<128xf32>
    %9 = vector.shape_cast %8 : vector<128xf32> to vector<1x128xf32>
    %c0_8 = arith.constant 0 : index
    %c0_9 = arith.constant 0 : index
    %c0_10 = arith.constant 0 : index
    %10 = vector.load %arg4[%c0_8, %c0_9, %c0_10] : memref<1x1x128xf32, #tpu.memory_space<vmem>>, vector<1x1x128xf32>
    %11 = vector.shape_cast %10 : vector<1x1x128xf32> to vector<1x128xf32>
    %12 = vector.shape_cast %9 : vector<1x128xf32> to vector<1x1x128xf32>
    tpu.vector_store %arg4[%c0_8, %c0_9, %c0_10], %12 {strides = array<i32>} : memref<1x1x128xf32, #tpu.memory_space<vmem>>, vector<1x1x128xf32>,
    %13 = arith.mulf %3, %3 : vector<4x128xf32>
    %cst_11 = arith.constant dense<0.000000e+00> : vector<128xf32>
    %14 = vector.multi_reduction <add>, %13, %cst_11 [0] : vector<4x128xf32> to vector<128xf32>
    %15 = vector.shape_cast %14 : vector<128xf32> to vector<1x128xf32>
    %c0_12 = arith.constant 0 : index
    %c0_13 = arith.constant 0 : index
    %c0_14 = arith.constant 0 : index
    %16 = vector.load %arg5[%c0_12, %c0_13, %c0_14] : memref<1x1x128xf32, #tpu.memory_space<vmem>>, vector<1x1x128xf32>
    %17 = vector.shape_cast %16 : vector<1x1x128xf32> to vector<1x128xf32>
    %18 = vector.shape_cast %15 : vector<1x128xf32> to vector<1x1x128xf32>
    tpu.vector_store %arg5[%c0_12, %c0_13, %c0_14], %18 {strides = array<i32>} : memref<1x1x128xf32, #tpu.memory_space<vmem>>, vector<1x1x128xf32>,
    return
  }
  func.func @transform_0(%arg0: i32) -> (i32, i32, i32) {
    %c0_i32 = arith.constant 0 : i32
    %c0_i32_0 = arith.constant 0 : i32
    %c0_i32_1 = arith.constant 0 : i32
    return %arg0, %c0_i32, %c0_i32_0 : i32, i32, i32
  }
  func.func @transform_1(%arg0: i32) -> (i32, i32) {
    %c0_i32 = arith.constant 0 : i32
    %c0_i32_0 = arith.constant 0 : i32
    %c0_i32_1 = arith.constant 0 : i32
    return %c0_i32, %c0_i32_0 : i32, i32
  }
  func.func @transform_2(%arg0: i32) -> (i32, i32, i32) {
    %c0_i32 = arith.constant 0 : i32
    %c0_i32_0 = arith.constant 0 : i32
    %c0_i32_1 = arith.constant 0 : i32
    return %arg0, %c0_i32, %c0_i32_0 : i32, i32, i32
  }
  func.func @transform_3(%arg0: i32) -> (i32, i32, i32) {
    %c0_i32 = arith.constant 0 : i32
    %c0_i32_0 = arith.constant 0 : i32
    %c0_i32_1 = arith.constant 0 : i32
    return %arg0, %c0_i32, %c0_i32_0 : i32, i32, i32
  }
  func.func @transform_4(%arg0: i32) -> (i32, i32, i32) {
    %c0_i32 = arith.constant 0 : i32
    %c0_i32_0 = arith.constant 0 : i32
    %c0_i32_1 = arith.constant 0 : i32
    return %arg0, %c0_i32, %c0_i32_0 : i32, i32, i32
  }
}

module attributes {stable_mosaic.version = 11 : i64} {
  func.func @_conv_stats_kernel(%arg0: i32, %arg1: memref<1x4x512xbf16, #tpu.memory_space<vmem>>, %arg2: memref<512x128xbf16, #tpu.memory_space<vmem>>, %arg3: memref<1x4x128xbf16, #tpu.memory_space<vmem>>, %arg4: memref<1x1x128xf32, #tpu.memory_space<vmem>>, %arg5: memref<1x1x128xf32, #tpu.memory_space<vmem>>) attributes {dimension_semantics = [#tpu.dimension_semantics<parallel>], iteration_bounds = array<i64: 2>, scalar_prefetch = 0 : i64, scratch_operands = 0 : i64, tpu.core_type = #tpu.core_type<tc>, window_params = [{transform_indices = @transform_0, window_bounds = array<i64: 1, 4, 512>}, {pipeline_mode = #tpu.pipeline_mode<synchronous>, transform_indices = @transform_1, window_bounds = array<i64: 512, 128>}, {transform_indices = @transform_2, window_bounds = array<i64: 1, 4, 128>}, {transform_indices = @transform_3, window_bounds = array<i64: 1, 1, 128>}, {transform_indices = @transform_4, window_bounds = array<i64: 1, 1, 128>}]} {
    %c0 = arith.constant 0 : index
    %c0_0 = arith.constant 0 : index
    %c0_1 = arith.constant 0 : index
    %0 = vector.load %arg1[%c0, %c0_0, %c0_1] : memref<1x4x512xbf16, #tpu.memory_space<vmem>>, vector<1x4x512xbf16>
    %1 = vector.shape_cast %0 : vector<1x4x512xbf16> to vector<4x512xbf16>
    %c0_2 = arith.constant 0 : index
    %c0_3 = arith.constant 0 : index
    %2 = vector.load %arg2[%c0_2, %c0_3] : memref<512x128xbf16, #tpu.memory_space<vmem>>, vector<512x128xbf16>
    %cst = arith.constant dense<0.000000e+00> : vector<4x128xf32>
    %3 = tpu.matmul %1, %2, %cst {dimension_numbers = #tpu.dot_dimension_numbers<[1], [0], [0], [1], [0, 0, 1, 1], [], []>} : vector<4x512xbf16>, vector<512x128xbf16>, vector<4x128xf32> -> vector<4x128xf32>
    %4 = arith.truncf %3 : vector<4x128xf32> to vector<4x128xbf16>
    %c0_4 = arith.constant 0 : index
    %c0_5 = arith.constant 0 : index
    %c0_6 = arith.constant 0 : index
    %5 = vector.load %arg3[%c0_4, %c0_5, %c0_6] : memref<1x4x128xbf16, #tpu.memory_space<vmem>>, vector<1x4x128xbf16>
    %6 = vector.shape_cast %5 : vector<1x4x128xbf16> to vector<4x128xbf16>
    %7 = vector.shape_cast %4 : vector<4x128xbf16> to vector<1x4x128xbf16>
    tpu.vector_store %arg3[%c0_4, %c0_5, %c0_6], %7 {strides = array<i32>} : memref<1x4x128xbf16, #tpu.memory_space<vmem>>, vector<1x4x128xbf16>,
    %cst_7 = arith.constant dense<0.000000e+00> : vector<128xf32>
    %8 = vector.multi_reduction <add>, %3, %cst_7 [0] : vector<4x128xf32> to vector<128xf32>
    %9 = vector.shape_cast %8 : vector<128xf32> to vector<1x128xf32>
    %c0_8 = arith.constant 0 : index
    %c0_9 = arith.constant 0 : index
    %c0_10 = arith.constant 0 : index
    %10 = vector.load %arg4[%c0_8, %c0_9, %c0_10] : memref<1x1x128xf32, #tpu.memory_space<vmem>>, vector<1x1x128xf32>
    %11 = vector.shape_cast %10 : vector<1x1x128xf32> to vector<1x128xf32>
    %12 = vector.shape_cast %9 : vector<1x128xf32> to vector<1x1x128xf32>
    tpu.vector_store %arg4[%c0_8, %c0_9, %c0_10], %12 {strides = array<i32>} : memref<1x1x128xf32, #tpu.memory_space<vmem>>, vector<1x1x128xf32>,
    %13 = arith.mulf %3, %3 : vector<4x128xf32>
    %cst_11 = arith.constant dense<0.000000e+00> : vector<128xf32>
    %14 = vector.multi_reduction <add>, %13, %cst_11 [0] : vector<4x128xf32> to vector<128xf32>
    %15 = vector.shape_cast %14 : vector<128xf32> to vector<1x128xf32>
    %c0_12 = arith.constant 0 : index
    %c0_13 = arith.constant 0 : index
    %c0_14 = arith.constant 0 : index
    %16 = vector.load %arg5[%c0_12, %c0_13, %c0_14] : memref<1x1x128xf32, #tpu.memory_space<vmem>>, vector<1x1x128xf32>
    %17 = vector.shape_cast %16 : vector<1x1x128xf32> to vector<1x128xf32>
    %18 = vector.shape_cast %15 : vector<1x128xf32> to vector<1x1x128xf32>
    tpu.vector_store %arg5[%c0_12, %c0_13, %c0_14], %18 {strides = array<i32>} : memref<1x1x128xf32, #tpu.memory_space<vmem>>, vector<1x1x128xf32>,
    return
  }
  func.func @transform_0(%arg0: i32) -> (i32, i32, i32) {
    %c0_i32 = arith.constant 0 : i32
    %c0_i32_0 = arith.constant 0 : i32
    %c0_i32_1 = arith.constant 0 : i32
    return %arg0, %c0_i32, %c0_i32_0 : i32, i32, i32
  }
  func.func @transform_1(%arg0: i32) -> (i32, i32) {
    %c0_i32 = arith.constant 0 : i32
    %c0_i32_0 = arith.constant 0 : i32
    %c0_i32_1 = arith.constant 0 : i32
    return %c0_i32, %c0_i32_0 : i32, i32
  }
  func.func @transform_2(%arg0: i32) -> (i32, i32, i32) {
    %c0_i32 = arith.constant 0 : i32
    %c0_i32_0 = arith.constant 0 : i32
    %c0_i32_1 = arith.constant 0 : i32
    return %arg0, %c0_i32, %c0_i32_0 : i32, i32, i32
  }
  func.func @transform_3(%arg0: i32) -> (i32, i32, i32) {
    %c0_i32 = arith.constant 0 : i32
    %c0_i32_0 = arith.constant 0 : i32
    %c0_i32_1 = arith.constant 0 : i32
    return %arg0, %c0_i32, %c0_i32_0 : i32, i32, i32
  }
  func.func @transform_4(%arg0: i32) -> (i32, i32, i32) {
    %c0_i32 = arith.constant 0 : i32
    %c0_i32_0 = arith.constant 0 : i32
    %c0_i32_1 = arith.constant 0 : i32
    return %arg0, %c0_i32, %c0_i32_0 : i32, i32, i32
  }
}

</mosaic_0001>

<bundles_post_ra>
// kernel: conv_autoencoder_forward.6
= control target key start
LH: loop header
LB: loop body
LE: loop exit
PB: predicated region body
PF: predicated region fallthrough
CT: control target
= control target key end

     0   :  { %s727_s15 = smov 0   ;;  %s789_s0 = inlined_call_operand.vmem [shape: bf16[2,64,128], index: 0, kind: input, shape index: {}]   ;;  %s790_s1 = inlined_call_operand.vmem [shape: bf16[128,128], index: 1, kind: input, shape index: {}]   ;;  %s791_s2 = inlined_call_operand.vmem [shape: bf16[2,64,128], index: 2, kind: output, shape index: {0}]   ;;  %s792_s3 = inlined_call_operand.vmem [shape: f32[2,1,128], index: 3, kind: output, shape index: {1}]   ;;  %s793_s4 = inlined_call_operand.vmem [shape: f32[2,1,128], index: 4, kind: output, shape index: {2}]  }
   0x1 LB: > { %s558_s16 = sadd.s32 4294967295, %s700_s15   ;;  %p562_p0 = scmp.ge.s32.totalorder %s700_s15, 1  ;;  %s700_s15 = sphi %s727_s15, %s15_s15  }
   0x2   : > { %p167_p1 = scmp.lt.s32.totalorder %s700_s15, 3 }
   0x4   : > { %p168_p2 = pnand %p562_p0, %p167_p1 }
   0x5   : > { %v682_v0 = vld [vmem:[%s790_s1] sm:$0xff] (!%p168_p2)   ;;  %p199_p3 = scmp.lt.s32.totalorder (!%p168_p2), %s558_s16, 1  ;;  %v683_v1 = vld [vmem:[%s790_s1 + $0x8] sm:$0xff] (!%p168_p2)   ;;  %v684_v2 = vld [vmem:[%s790_s1 + $0x10] sm:$0xff] (!%p168_p2)  }
   0x6   : > { %171 = sbr.rel (%p168_p2) target bundleno = 282 (0x11a), region = 28  ;;  %634 = vmatprep.subr.bf16.mxu0 (!%p168_p2), %v682_v0  ;;  %658 = vmatprep.subr.bf16.mxu1 (!%p168_p2), %v682_v0  ;;  %v685_v3 = vld [vmem:[%s790_s1 + $0x18] sm:$0xff] (!%p168_p2)   ;;  %v686_v6 = vld [vmem:[%s790_s1 + $0x20] sm:$0xff] (!%p168_p2)   ;;  %v687_v7 = vld [vmem:[%s790_s1 + $0x28] sm:$0xff] (!%p168_p2)  }
   0x7   : > { %635 = vmatpush3.bf16.msra.mxu0 (!%p168_p2), %v682_v0  ;;  %666 = vmatpush3.bf16.msra.mxu1 (!%p168_p2), %v682_v0  ;;  %v688_v8 = vld [vmem:[%s790_s1 + $0x30] sm:$0xff] (!%p168_p2)   ;;  %v689_v9 = vld [vmem:[%s790_s1 + $0x38] sm:$0xff] (!%p168_p2)  }
   0x8   : > { %636 = vmatprep.subr.bf16.mxu0 (!%p168_p2), %v683_v1  ;;  %659 = vmatprep.subr.bf16.mxu1 (!%p168_p2), %v683_v1 }
   0xb   : > { %637 = vmatpush3.bf16.msra.mxu0 (!%p168_p2), %v683_v1  ;;  %667 = vmatpush3.bf16.msra.mxu1 (!%p168_p2), %v683_v1 }
   0xc   : > { %638 = vmatprep.subr.bf16.mxu0 (!%p168_p2), %v684_v2  ;;  %660 = vmatprep.subr.bf16.mxu1 (!%p168_p2), %v684_v2 }
   0xd   : > { %s795_s16 = smov (!%p199_p3, %s558_s16), 1 }
   0xe   : > { %s589_s23 = sshll.u32 %s795_s16, 5  ;;  %s211_s18 = scalar_lea.vmem %s792_s3, %s795_s16 }
   0xf   : > { %s752_s26 = scalar_lea.vmem %s789_s0, %s589_s23  ;;  %639 = vmatpush3.bf16.msra.mxu0 %v684_v2  ;;  %668 = vmatpush3.bf16.msra.mxu1 %v684_v2  ;;  %s208_s13 = scalar_lea.vmem %s791_s2, %s589_s23 }
  0x10   : > { %v690_v4 = vld [vmem:[%s752_s26] sm:$0xff]   ;;  %v692_v5 = vld [vmem:[%s752_s26 + $0x10] sm:$0xff]   ;;  %640 = vmatprep.subr.bf16.mxu0 %v685_v3  ;;  %661 = vmatprep.subr.bf16.mxu1 %v685_v3  ;;  %v691_v10 = vld [vmem:[%s752_s26 + $0x8] sm:$0xff]   ;;  %s214_s21 = scalar_lea.vmem %s793_s4, %s795_s16 }
  0x11   : > { %650 = vmatprep.mubr.bf16.mxu0 %v690_v4  ;;  %654 = vmatprep.mubr.bf16.mxu1 %v692_v5  ;;  %v693_v11 = vld [vmem:[%s752_s26 + $0x18] sm:$0xff]  }
  0x13   : > { %641 = vmatpush3.bf16.msra.mxu0 %v685_v3  ;;  %669 = vmatpush3.bf16.msra.mxu1 %v685_v3 }
  0x14   : > { %642 = vmatprep.subr.bf16.mxu0 %v686_v6  ;;  %662 = vmatprep.subr.bf16.mxu1 %v686_v6 }
  0x17   : > { %643 = vmatpush3.bf16.msra.mxu0 %v686_v6  ;;  %670 = vmatpush3.bf16.msra.mxu1 %v686_v6 }
  0x18   : > { %644 = vmatprep.subr.bf16.mxu0 %v687_v7  ;;  %663 = vmatprep.subr.bf16.mxu1 %v687_v7 }
  0x1b   : > { %645 = vmatpush3.bf16.msra.mxu0 %v687_v7  ;;  %671 = vmatpush3.bf16.msra.mxu1 %v687_v7 }
  0x1c   : > { %646 = vmatprep.subr.bf16.mxu0 %v688_v8  ;;  %664 = vmatprep.subr.bf16.mxu1 %v688_v8 }
  0x1f   : > { %647 = vmatpush3.bf16.msra.mxu0 %v688_v8  ;;  %672 = vmatpush3.bf16.msra.mxu1 %v688_v8 }
  0x20   : > { %648 = vmatprep.subr.bf16.mxu0 %v689_v9  ;;  %665 = vmatprep.subr.bf16.mxu1 %v689_v9 }
  0x23   : > { %649 = vmatpush3.bf16.msra.mxu0 %v689_v9  ;;  %673 = vmatpush3.bf16.msra.mxu1 %v689_v9 }
  0x26   : > { %651 = vmatmul.mubr.bf16.vlgmr.msra.gmra.mrb[0].mxu0 %v691_v10  ;;  %655 = vmatmul.mubr.bf16.vlgmr.msra.gmra.mrb[0].mxu1 %v693_v11 }
  0xf9   : > { %v652_v12 = vpop.f32.mrb[0].mxu0  ;;  %v656_v13 = vpop.f32.mrb[0].mxu1 }
  0xfa   : > { %v346_v14 = vpop.f32.mrb[1].mxu0  ;;  %v362_v15 = vpop.f32.mrb[1].mxu1  ;;  %v433_v27 = vmul.f32 %v652_v12, %v652_v12  ;;  %v437_v39 = vmul.f32 %v656_v13, %v656_v13 }
  0xfb   : > { %v653_v16 = vpop.f32.mrb[2].mxu0  ;;  %v657_v17 = vpop.f32.mrb[2].mxu1  ;;  %v431_v18 = vmul.f32 %v346_v14, %v346_v14  ;;  %v435_v33 = vmul.f32 %v362_v15, %v362_v15 }
  0xfc   : > { %v607_v19 = vpack.c.bf16 %v653_v16, %v652_v12  ;;  %v349_v20 = vpop.f32.mrb[3].mxu0  ;;  %v617_v21 = vpack.c.bf16 %v657_v17, %v656_v13  ;;  %v365_v22 = vpop.f32.mrb[3].mxu1  ;;  %v434_v30 = vmul.f32 %v653_v16, %v653_v16  ;;  %v438_v42 = vmul.f32 %v657_v17, %v657_v17 }
  0xfd   : > { %v602_v23 = vpack.c.bf16 %v349_v20, %v346_v14  ;;  %v417_v24 = vadd.f32 %v349_v20, %v346_v14  ;;  %v432_v25 = vmul.f32 %v349_v20, %v349_v20  ;;  %v612_v26 = vpack.c.bf16 %v365_v22, %v362_v15 }
  0xfe   : > { %619 = vst [vmem:[%s208_s13 + $0x8] sm:$0xff] %v607_v19   ;;  %621 = vst [vmem:[%s208_s13 + $0x18] sm:$0xff] %v617_v21   ;;  %v436_v38 = vmul.f32 %v365_v22, %v365_v22 }
  0xff   : > { %603 = vst [vmem:[%s208_s13] sm:$0xff] %v602_v23   ;;  %v418_v28 = vadd.f32 %v652_v12, %v417_v24  ;;  %v439_v29 = vadd.f32 %v432_v25, %v431_v18  ;;  %620 = vst [vmem:[%s208_s13 + $0x10] sm:$0xff] %v612_v26  }
 0x101   : > { %v440_v31 = vadd.f32 %v439_v29, %v433_v27  ;;  %v419_v32 = vadd.f32 %v653_v16, %v418_v28 }
 0x103   : > { %v420_v34 = vadd.f32 %v419_v32, %v362_v15  ;;  %v441_v35 = vadd.f32 %v440_v31, %v434_v30 }
 0x105   : > { %v442_v36 = vadd.f32 %v441_v35, %v435_v33  ;;  %v421_v37 = vadd.f32 %v420_v34, %v365_v22 }
 0x107   : > { %v422_v40 = vadd.f32 %v656_v13, %v421_v37  ;;  %v443_v41 = vadd.f32 %v442_v36, %v436_v38 }
 0x109   : > { %v423_v43 = vadd.f32 %v657_v17, %v422_v40  ;;  %v444_v44 = vadd.f32 %v443_v41, %v437_v39 }
 0x10b   : > { %v424_v45 = vrot.slane %v423_v43, 4  ;;  %v445_v46 = vadd.f32 %v444_v44, %v438_v42 }
 0x10d   : > { %v425_v47 = vadd.f32 %v424_v45, %v423_v43  ;;  %v446_v48 = vrot.slane %v445_v46, 4 }
 0x10f   : > { %v426_v49 = vrot.slane %v425_v47, 2  ;;  %v447_v50 = vadd.f32 %v446_v48, %v445_v46 }
 0x111   : > { %v427_v51 = vadd.f32 %v426_v49, %v425_v47  ;;  %v448_v52 = vrot.slane %v447_v50, 2 }
 0x113   : > { %v428_v53 = vrot.slane %v427_v51, 1  ;;  %v449_v54 = vadd.f32 %v448_v52, %v447_v50 }
 0x115   : > { %v429_v55 = vadd.f32 %v428_v53, %v427_v51  ;;  %v450_v56 = vrot.slane %v449_v54, 1 }
 0x117   : > { %430 = vst [vmem:[%s211_s18] sm:$0x1] %v429_v55  ;;  %v451_v57 = vadd.f32 %v450_v56, %v449_v54 }
 0x119   : > { %452 = vst [vmem:[%s214_s21] sm:$0x1] %v451_v57 }
 0x11a PF: > { %s15_s15 = sadd.s32 1, %s700_s15  }
 0x11b   : > { %p12_p4 = scmp.ge.s32.totalorder %s15_s15, 4  }
 0x11d   :  { %14 = sbr.rel (!%p12_p4) target bundleno = 1 (0x1), region = 82 }

// kernel: conv_autoencoder_forward.7
= control target key start
LH: loop header
LB: loop body
LE: loop exit
PB: predicated region body
PF: predicated region fallthrough
CT: control target
= control target key end

     0   :  { %s652_s15 = smov 0   ;;  %s729_s0 = inlined_call_operand.vmem [shape: bf16[2,16,256], index: 0, kind: input, shape index: {}]   ;;  %s730_s1 = inlined_call_operand.vmem [shape: bf16[256,128], index: 1, kind: input, shape index: {}]   ;;  %s731_s2 = inlined_call_operand.vmem [shape: bf16[2,16,128], index: 2, kind: output, shape index: {0}]   ;;  %s732_s3 = inlined_call_operand.vmem [shape: f32[2,1,128], index: 3, kind: output, shape index: {1}]   ;;  %s733_s4 = inlined_call_operand.vmem [shape: f32[2,1,128], index: 4, kind: output, shape index: {2}]  }
   0x1 LB: > { %s530_s16 = sadd.s32 4294967295, %s625_s15   ;;  %p534_p0 = scmp.ge.s32.totalorder %s625_s15, 1  ;;  %s625_s15 = sphi %s652_s15, %s15_s15  }
   0x2   : > { %p167_p1 = scmp.lt.s32.totalorder %s625_s15, 3 }
   0x4   : > { %p168_p2 = pnand %p534_p0, %p167_p1 }
   0x5   : > { %v600_v0 = vld [vmem:[%s730_s1 + $0x40] sm:$0xff] (!%p168_p2)   ;;  %v602_v2 = vld [vmem:[%s730_s1 + $0x48] sm:$0xff] (!%p168_p2)   ;;  %p199_p3 = scmp.lt.s32.totalorder (!%p168_p2), %s530_s16, 1  ;;  %v604_v4 = vld [vmem:[%s730_s1 + $0x50] sm:$0xff] (!%p168_p2)  }
   0x6   : > { %171 = sbr.rel (%p168_p2) target bundleno = 272 (0x110), region = 28  ;;  %v601_v1 = vld [vmem:[%s730_s1] sm:$0xff] (!%p168_p2)   ;;  %570 = vmatprep.subr.bf16.mxu0 (!%p168_p2), %v600_v0  ;;  %v603_v3 = vld [vmem:[%s730_s1 + $0x8] sm:$0xff] (!%p168_p2)   ;;  %v605_v5 = vld [vmem:[%s730_s1 + $0x10] sm:$0xff] (!%p168_p2)  }
   0x7   : > { %571 = vmatpush3.bf16.msra.mxu0 (!%p168_p2), %v601_v1  ;;  %v606_v6 = vld [vmem:[%s730_s1 + $0x58] sm:$0xff] (!%p168_p2)   ;;  %v608_v8 = vld [vmem:[%s730_s1 + $0x60] sm:$0xff] (!%p168_p2)   ;;  %v610_v10 = vld [vmem:[%s730_s1 + $0x68] sm:$0xff] (!%p168_p2)  }
   0x8   : > { %572 = vmatprep.subr.bf16.mxu0 (!%p168_p2), %v602_v2  ;;  %v607_v7 = vld [vmem:[%s730_s1 + $0x18] sm:$0xff] (!%p168_p2)   ;;  %v609_v9 = vld [vmem:[%s730_s1 + $0x20] sm:$0xff] (!%p168_p2)   ;;  %v611_v12 = vld [vmem:[%s730_s1 + $0x28] sm:$0xff] (!%p168_p2)  }
   0x9   : > { %v612_v13 = vld [vmem:[%s730_s1 + $0x70] sm:$0xff] (!%p168_p2)   ;;  %v614_v15 = vld [vmem:[%s730_s1 + $0x78] sm:$0xff] (!%p168_p2)  }
   0xa   : > { %v613_v14 = vld [vmem:[%s730_s1 + $0x30] sm:$0xff] (!%p168_p2)   ;;  %v615_v16 = vld [vmem:[%s730_s1 + $0x38] sm:$0xff] (!%p168_p2)  }
   0xb   : > { %573 = vmatpush3.bf16.msra.mxu0 (!%p168_p2), %v603_v3 }
   0xc   : > { %574 = vmatprep.subr.bf16.mxu0 (!%p168_p2), %v604_v4 }
   0xd   : > { %s735_s16 = smov (!%p199_p3, %s530_s16), 1 }
   0xe   : > { %s561_s7 = sshll.u32 %s735_s16, 4  ;;  %s562_s29 = sshll.u32 %s735_s16, 3 }
   0xf   : > { %575 = vmatpush3.bf16.msra.mxu0 %v605_v5  ;;  %s203_s12 = scalar_lea.vmem %s729_s0, %s561_s7  ;;  %s208_s6 = scalar_lea.vmem %s731_s2, %s562_s29 }
  0x10   : > { %576 = vmatprep.subr.bf16.mxu0 %v606_v6  ;;  %v618_v11 = vld [vmem:[%s203_s12 + $0x4] ss:$8 sps:$4 sm:$0xff]   ;;  %v616_v17 = vld [vmem:[%s203_s12] ss:$8 sps:$4 sm:$0xff]   ;;  %s211_s9 = scalar_lea.vmem %s732_s3, %s735_s16  ;;  %s214_s12 = scalar_lea.vmem %s733_s4, %s735_s16 }
  0x11   : > { %388 = vmatprep.mubr.bf16.mxu0 %v618_v11 }
  0x13   : > { %577 = vmatpush3.bf16.msra.mxu0 %v607_v7 }
  0x14   : > { %578 = vmatprep.subr.bf16.mxu0 %v608_v8 }
  0x17   : > { %579 = vmatpush3.bf16.msra.mxu0 %v609_v9 }
  0x18   : > { %580 = vmatprep.subr.bf16.mxu0 %v610_v10 }
  0x1b   : > { %581 = vmatpush3.bf16.msra.mxu0 %v611_v12 }
  0x1c   : > { %582 = vmatprep.subr.bf16.mxu0 %v612_v13 }
  0x1f   : > { %583 = vmatpush3.bf16.msra.mxu0 %v613_v14 }
  0x20   : > { %584 = vmatprep.subr.bf16.mxu0 %v614_v15 }
  0x23   : > { %585 = vmatpush3.bf16.msra.mxu0 %v615_v16 }
  0x26   : > { %389 = vmatmul.mubr.bf16.vlgmr.msra.gmra.mrb[0].mxu0 %v616_v17 }
  0xf9   : > { %v586_v18 = vpop.f32.mrb[0].mxu0 }
  0xfa   : > { %v587_v19 = vpop.f32.mrb[1].mxu0 }
  0xfb   : > { %v588_v20 = vadd.f32 %v587_v19, %v586_v18  ;;  %v589_v21 = vpop.f32.mrb[2].mxu0 }
  0xfc   : > { %v590_v22 = vpop.f32.mrb[3].mxu0 }
  0xfd   : > { %v591_v23 = vadd.f32 %v590_v22, %v589_v21  ;;  %v415_v24 = vmul.f32 %v588_v20, %v588_v20 }
  0xff   : > { %v568_v25 = vpack.c.bf16 %v591_v23, %v588_v20  ;;  %v407_v26 = vadd.f32 %v591_v23, %v588_v20  ;;  %v416_v27 = vmul.f32 %v591_v23, %v591_v23 }
 0x101   : > { %569 = vst [vmem:[%s208_s6] sm:$0xff] %v568_v25   ;;  %v408_v28 = vrot.slane %v407_v26, 4  ;;  %v417_v29 = vadd.f32 %v416_v27, %v415_v24 }
 0x103   : > { %v409_v30 = vadd.f32 %v408_v28, %v407_v26  ;;  %v418_v31 = vrot.slane %v417_v29, 4 }
 0x105   : > { %v410_v32 = vrot.slane %v409_v30, 2  ;;  %v419_v33 = vadd.f32 %v418_v31, %v417_v29 }
 0x107   : > { %v411_v34 = vadd.f32 %v410_v32, %v409_v30  ;;  %v420_v35 = vrot.slane %v419_v33, 2 }
 0x109   : > { %v412_v36 = vrot.slane %v411_v34, 1  ;;  %v421_v37 = vadd.f32 %v420_v35, %v419_v33 }
 0x10b   : > { %v413_v38 = vadd.f32 %v412_v36, %v411_v34  ;;  %v422_v39 = vrot.slane %v421_v37, 1 }
 0x10d   : > { %414 = vst [vmem:[%s211_s9] sm:$0x1] %v413_v38  ;;  %v423_v40 = vadd.f32 %v422_v39, %v421_v37 }
 0x10f   : > { %424 = vst [vmem:[%s214_s12] sm:$0x1] %v423_v40 }
 0x110 PF: > { %s15_s15 = sadd.s32 1, %s625_s15  }
 0x111   : > { %p12_p4 = scmp.ge.s32.totalorder %s15_s15, 4  }
 0x113   :  { %14 = sbr.rel (!%p12_p4) target bundleno = 1 (0x1), region = 82 }

// kernel: conv_autoencoder_forward.8
= control target key start
LH: loop header
LB: loop body
LE: loop exit
PB: predicated region body
PF: predicated region fallthrough
CT: control target
= control target key end

     0   :  { %s787_s15 = smov 0   ;;  %s901_s0 = inlined_call_operand.vmem [shape: bf16[2,4,384], index: 0, kind: input, shape index: {}]   ;;  %s902_s1 = inlined_call_operand.vmem [shape: bf16[384,128], index: 1, kind: input, shape index: {}]   ;;  %s903_s2 = inlined_call_operand.vmem [shape: bf16[2,4,128], index: 2, kind: output, shape index: {0}]   ;;  %s904_s3 = inlined_call_operand.vmem [shape: f32[2,1,128], index: 3, kind: output, shape index: {1}]   ;;  %s905_s4 = inlined_call_operand.vmem [shape: f32[2,1,128], index: 4, kind: output, shape index: {2}]  }
   0x1 LB: > { %s630_s16 = sadd.s32 4294967295, %s757_s15   ;;  %p634_p0 = scmp.ge.s32.totalorder %s757_s15, 1  ;;  %s757_s15 = sphi %s787_s15, %s15_s15  }
   0x2   : > { %p167_p1 = scmp.lt.s32.totalorder %s757_s15, 3 }
   0x4   : > { %p168_p2 = pnand %p634_p0, %p167_p1 }
   0x5   : > { %v726_v0 = vld [vmem:[%s902_s1 + $0x40] sm:$0xff] (!%p168_p2)   ;;  %v759_v1 = vmov (!%p168_p2), 0.0   ;;  %v729_v4 = vld [vmem:[%s902_s1 + $0x48] sm:$0xff] (!%p168_p2)   ;;  %v732_v7 = vld [vmem:[%s902_s1 + $0x50] sm:$0xff] (!%p168_p2)   ;;  %vm760_vm0 = vmmov (!%p168_p2), 0   ;;  %p198_p3 = scmp.lt.s32.totalorder (!%p168_p2), %s630_s16, 1  ;;  %v268_v20 = vlaneseq (!%p168_p2) }
   0x6   : > { %171 = sbr.rel (%p168_p2) target bundleno = 271 (0x10f), region = 28  ;;  %694 = vmatprep.subr.bf16.mxu1 (!%p168_p2), %v759_v1  ;;  %v727_v2 = vld [vmem:[%s902_s1] sm:$0xff] (!%p168_p2)   ;;  %663 = vmatprep.subr.bf16.mxu0 (!%p168_p2), %v726_v0  ;;  %v730_v5 = vld [vmem:[%s902_s1 + $0x8] sm:$0xff] (!%p168_p2)   ;;  %v733_v8 = vld [vmem:[%s902_s1 + $0x10] sm:$0xff] (!%p168_p2)   ;;  %v761_v25 = vmov (!%p168_p2), 1983009808  }
   0x7   : > { %v728_v3 = vld [vmem:[%s902_s1 + $0x80] sm:$0xff] (!%p168_p2)   ;;  %664 = vmatpush3.bf16.msra.mxu0 (!%p168_p2), %v727_v2  ;;  %v731_v6 = vld [vmem:[%s902_s1 + $0x88] sm:$0xff] (!%p168_p2)   ;;  %710 = vmatprep.mubr.msk.bf16.mxu1 (!%p168_p2), %vm760_vm0, %v759_v1  ;;  %v734_v9 = vld [vmem:[%s902_s1 + $0x90] sm:$0xff] (!%p168_p2)   ;;  %v266_v26 = vunpack.c.l.s4 (!%p168_p2), %v761_v25  ;;  %v269_v27 = vshrl.u32 (!%p168_p2), %v268_v20, 7  ;;  %vm509_vm1 = vcmask (!%p168_p2), 1043456  }
   0x8   : > { %695 = vmatpush3.bf16.msra.mxu1 (!%p168_p2), %v728_v3  ;;  %665 = vmatprep.subr.bf16.mxu0 (!%p168_p2), %v729_v4  ;;  %v735_v10 = vld [vmem:[%s902_s1 + $0x58] sm:$0xff] (!%p168_p2)   ;;  %v738_v13 = vld [vmem:[%s902_s1 + $0x60] sm:$0xff] (!%p168_p2)   ;;  %v741_v16 = vld [vmem:[%s902_s1 + $0x68] sm:$0xff] (!%p168_p2)  }
   0x9   : > { %696 = vmatprep.subr.bf16.mxu1 (!%p168_p2), %v759_v1  ;;  %v736_v11 = vld [vmem:[%s902_s1 + $0x18] sm:$0xff] (!%p168_p2)   ;;  %v739_v14 = vld [vmem:[%s902_s1 + $0x20] sm:$0xff] (!%p168_p2)   ;;  %v742_v17 = vld [vmem:[%s902_s1 + $0x28] sm:$0xff] (!%p168_p2)   ;;  %v267_v30 = vunpack.c.0.s8 (!%p168_p2), %v266_v26 }
   0xa   : > { %v737_v12 = vld [vmem:[%s902_s1 + $0x98] sm:$0xff] (!%p168_p2)   ;;  %v740_v15 = vld [vmem:[%s902_s1 + $0xa0] sm:$0xff] (!%p168_p2)   ;;  %v743_v18 = vld [vmem:[%s902_s1 + $0xa8] sm:$0xff] (!%p168_p2)  }
   0xb   : > { %666 = vmatpush3.bf16.msra.mxu0 (!%p168_p2), %v730_v5  ;;  %v744_v19 = vld [vmem:[%s902_s1 + $0x70] sm:$0xff] (!%p168_p2)   ;;  %v747_v23 = vld [vmem:[%s902_s1 + $0x78] sm:$0xff] (!%p168_p2)   ;;  %v270_v32 = vsub.s32 (!%p168_p2), %v267_v30, %v269_v27 }
   0xc   : > { %697 = vmatpush3.bf16.msra.mxu1 (!%p168_p2), %v731_v6  ;;  %667 = vmatprep.subr.bf16.mxu0 (!%p168_p2), %v732_v7  ;;  %v745_v21 = vld [vmem:[%s902_s1 + $0x30] sm:$0xff] (!%p168_p2)   ;;  %v748_v28 = vld [vmem:[%s902_s1 + $0x38] sm:$0xff] (!%p168_p2)  }
   0xd   : > { %698 = vmatprep.subr.bf16.mxu1 %v759_v1  ;;  %s907_s16 = smov (!%p198_p3, %s630_s16), 1  ;;  %v746_v22 = vld [vmem:[%s902_s1 + $0xb0] sm:$0xff]   ;;  %v749_v31 = vld [vmem:[%s902_s1 + $0xb8] sm:$0xff]  }
   0xe   : > { %s714_s25 = smul.u32 6, %s907_s16  ;;  %s636_s21 = sshll.u32 %s907_s16, 1 }
   0xf   : > { %668 = vmatpush3.bf16.msra.mxu0 %v733_v8  ;;  %s206_s24 = scalar_lea.vmem %s903_s2, %s636_s21  ;;  %s209_s27 = scalar_lea.vmem %s904_s3, %s907_s16 }
  0x10   : > { %699 = vmatpush3.bf16.msra.mxu1 %v734_v9  ;;  %669 = vmatprep.subr.bf16.mxu0 %v735_v10  ;;  %s202_s8 = scalar_lea.vmem %s901_s0, %s714_s25  ;;  %s212_s30 = scalar_lea.vmem %s905_s4, %s907_s16 }
  0x11   : > { %700 = vmatprep.subr.bf16.mxu1 %v759_v1  ;;  %v214_v24 = vld [vmem:[%s202_s8] sm:$0x3f] }
  0x12   : > { %v264_v29 = vcombine.high %v214_v24, %v214_v24  ;;  %v271_v33 = vrot.slane %v214_v24, %v270_v32 }
  0x13   : > { %670 = vmatpush3.bf16.msra.mxu0 %v736_v11 }
  0x14   : > { %701 = vmatpush3.bf16.msra.mxu1 %v737_v12  ;;  %671 = vmatprep.subr.bf16.mxu0 %v738_v13  ;;  %v278_v34 = vrot.slane %v264_v29, %v270_v32  ;;  %v279_v35 = vcombine.high %v271_v33, %v271_v33 }
  0x15   : > { %702 = vmatprep.subr.bf16.mxu1 %v759_v1 }
  0x16   : > { %459 = vmatprep.mubr.bf16.mxu0 %v279_v35 }
  0x17   : > { %672 = vmatpush3.bf16.msra.mxu0 %v739_v14 }
  0x18   : > { %703 = vmatpush3.bf16.msra.mxu1 %v740_v15  ;;  %673 = vmatprep.subr.bf16.mxu0 %v741_v16 }
  0x19   : > { %704 = vmatprep.subr.bf16.mxu1 %v759_v1 }
  0x1b   : > { %674 = vmatpush3.bf16.msra.mxu0 %v742_v17 }
  0x1c   : > { %705 = vmatpush3.bf16.msra.mxu1 %v743_v18  ;;  %675 = vmatprep.subr.bf16.mxu0 %v744_v19 }
  0x1d   : > { %706 = vmatprep.subr.bf16.mxu1 %v759_v1 }
  0x1f   : > { %676 = vmatpush3.bf16.msra.mxu0 %v745_v21 }
  0x20   : > { %707 = vmatpush3.bf16.msra.mxu1 %v746_v22  ;;  %677 = vmatprep.subr.bf16.mxu0 %v747_v23 }
  0x21   : > { %708 = vmatprep.subr.bf16.mxu1 %v759_v1 }
  0x23   : > { %678 = vmatpush3.bf16.msra.mxu0 %v748_v28 }
  0x24   : > { %709 = vmatpush3.bf16.msra.mxu1 %v749_v31 }
  0x26   : > { %460 = vmatmul.mubr.bf16.vlgmr.msra.gmra.mrb[0].mxu0 %v271_v33 }
  0x27   : > { %711 = vmatmul.mubr.bf16.vlgmr.msra.gmra.mrb[0].mxu1 %v278_v34 }
  0xf9   : > { %v679_v37 = vpop.f32.mrb[0].mxu0 }
  0xfa   : > { %v501_v36 = vpop.f32.mrb[0].mxu1  ;;  %v680_v39 = vpop.f32.mrb[1].mxu0 }
  0xfb   : > { %v712_v38 = vpop.f32.mrb[1].mxu1  ;;  %v681_v41 = vadd.f32 %v680_v39, %v679_v37  ;;  %v682_v42 = vpop.f32.mrb[2].mxu0 }
  0xfc   : > { %v504_v40 = vpop.f32.mrb[2].mxu1  ;;  %v683_v44 = vpop.f32.mrb[3].mxu0 }
  0xfd   : > { %v713_v43 = vpop.f32.mrb[3].mxu1  ;;  %v502_v45 = vadd.f32 %v681_v41, %v501_v36 }
  0xff   : > { %v507_v46 = vpack.c.bf16 %v502_v45, %v502_v45  ;;  %v510_v47 = vsel %vm509_vm1, %v502_v45, 0.0  ;;  %v518_v48 = vmul.f32 %v502_v45, %v502_v45 }
 0x100   : > { %v511_v49 = vrot.slane %v510_v47, 4 }
 0x101   : > { %508 = vst [vmem:[%s206_s24] sm:$0x3] %v507_v46  ;;  %v519_v50 = vsel %vm509_vm1, %v518_v48, 0.0 }
 0x102   : > { %v512_v51 = vadd.f32 %v511_v49, %v510_v47  ;;  %v520_v52 = vrot.slane %v519_v50, 4 }
 0x104   : > { %v513_v53 = vrot.slane %v512_v51, 2  ;;  %v521_v54 = vadd.f32 %v520_v52, %v519_v50 }
 0x106   : > { %v514_v55 = vadd.f32 %v513_v53, %v512_v51  ;;  %v522_v56 = vrot.slane %v521_v54, 2 }
 0x108   : > { %v515_v57 = vrot.slane %v514_v55, 1  ;;  %v523_v58 = vadd.f32 %v522_v56, %v521_v54 }
 0x10a   : > { %v516_v59 = vadd.f32 %v515_v57, %v514_v55  ;;  %v524_v60 = vrot.slane %v523_v58, 1 }
 0x10c   : > { %517 = vst [vmem:[%s209_s27] sm:$0x1] %v516_v59  ;;  %v525_v61 = vadd.f32 %v524_v60, %v523_v58 }
 0x10e   : > { %526 = vst [vmem:[%s212_s30] sm:$0x1] %v525_v61 }
 0x10f PF: > { %s15_s15 = sadd.s32 1, %s757_s15  }
 0x110   : > { %p12_p4 = scmp.ge.s32.totalorder %s15_s15, 4  }
 0x112   :  { %14 = sbr.rel (!%p12_p4) target bundleno = 1 (0x1), region = 82 }

// kernel: conv_autoencoder_forward.9
= control target key start
LH: loop header
LB: loop body
LE: loop exit
PB: predicated region body
PF: predicated region fallthrough
CT: control target
= control target key end

     0   :  { %s859_s15 = smov 0   ;;  %s988_s0 = inlined_call_operand.vmem [shape: bf16[2,4,512], index: 0, kind: input, shape index: {}]   ;;  %s989_s1 = inlined_call_operand.vmem [shape: bf16[512,128], index: 1, kind: input, shape index: {}]   ;;  %s990_s2 = inlined_call_operand.vmem [shape: bf16[2,4,128], index: 2, kind: output, shape index: {0}]   ;;  %s991_s3 = inlined_call_operand.vmem [shape: f32[2,1,128], index: 3, kind: output, shape index: {1}]   ;;  %s992_s4 = inlined_call_operand.vmem [shape: f32[2,1,128], index: 4, kind: output, shape index: {2}]  }
   0x1 LB: > { %s696_s16 = sadd.s32 4294967295, %s831_s15   ;;  %p700_p0 = scmp.ge.s32.totalorder %s831_s15, 1  ;;  %s831_s15 = sphi %s859_s15, %s15_s15  }
   0x2   : > { %p167_p1 = scmp.lt.s32.totalorder %s831_s15, 3 }
   0x4   : > { %p168_p2 = pnand %p700_p0, %p167_p1 }
   0x5   : > { %v792_v0 = vld [vmem:[%s989_s1 + $0x40] sm:$0xff] (!%p168_p2)   ;;  %v796_v4 = vld [vmem:[%s989_s1 + $0x48] sm:$0xff] (!%p168_p2)   ;;  %v800_v8 = vld [vmem:[%s989_s1 + $0x50] sm:$0xff] (!%p168_p2)   ;;  %p198_p3 = scmp.lt.s32.totalorder (!%p168_p2), %s696_s16, 1  ;;  %v284_v30 = vlaneseq (!%p168_p2)  ;;  %v833_v34 = vmov (!%p168_p2), 1983009808  }
   0x6   : > { %171 = sbr.rel (%p168_p2) target bundleno = 273 (0x111), region = 28  ;;  %v793_v1 = vld [vmem:[%s989_s1 + $0xc0] sm:$0xff] (!%p168_p2)   ;;  %739 = vmatprep.subr.bf16.mxu0 (!%p168_p2), %v792_v0  ;;  %v797_v5 = vld [vmem:[%s989_s1 + $0xc8] sm:$0xff] (!%p168_p2)   ;;  %v801_v9 = vld [vmem:[%s989_s1 + $0xd0] sm:$0xff] (!%p168_p2)   ;;  %v282_v35 = vunpack.c.l.s4 (!%p168_p2), %v833_v34  ;;  %vm575_vm0 = vcmask (!%p168_p2), 1043456  }
   0x7   : > { %v794_v2 = vld [vmem:[%s989_s1] sm:$0xff] (!%p168_p2)   ;;  %761 = vmatprep.subr.bf16.mxu1 (!%p168_p2), %v793_v1  ;;  %v798_v6 = vld [vmem:[%s989_s1 + $0x8] sm:$0xff] (!%p168_p2)   ;;  %v802_v10 = vld [vmem:[%s989_s1 + $0x10] sm:$0xff] (!%p168_p2)   ;;  %v285_v36 = vshrl.u32 (!%p168_p2), %v284_v30, 7 }
   0x8   : > { %v795_v3 = vld [vmem:[%s989_s1 + $0x80] sm:$0xff] (!%p168_p2)   ;;  %740 = vmatpush3.bf16.msra.mxu0 (!%p168_p2), %v794_v2  ;;  %v799_v7 = vld [vmem:[%s989_s1 + $0x88] sm:$0xff] (!%p168_p2)   ;;  %v803_v11 = vld [vmem:[%s989_s1 + $0x90] sm:$0xff] (!%p168_p2)   ;;  %v283_v37 = vunpack.c.0.s8 (!%p168_p2), %v282_v35 }
   0x9   : > { %762 = vmatpush3.bf16.msra.mxu1 (!%p168_p2), %v795_v3  ;;  %741 = vmatprep.subr.bf16.mxu0 (!%p168_p2), %v796_v4  ;;  %v804_v12 = vld [vmem:[%s989_s1 + $0x58] sm:$0xff] (!%p168_p2)   ;;  %v808_v16 = vld [vmem:[%s989_s1 + $0x60] sm:$0xff] (!%p168_p2)   ;;  %v812_v20 = vld [vmem:[%s989_s1 + $0x68] sm:$0xff] (!%p168_p2)  }
   0xa   : > { %763 = vmatprep.subr.bf16.mxu1 (!%p168_p2), %v797_v5  ;;  %v805_v13 = vld [vmem:[%s989_s1 + $0xd8] sm:$0xff] (!%p168_p2)   ;;  %v809_v17 = vld [vmem:[%s989_s1 + $0xe0] sm:$0xff] (!%p168_p2)   ;;  %v813_v21 = vld [vmem:[%s989_s1 + $0xe8] sm:$0xff] (!%p168_p2)   ;;  %v286_v39 = vsub.s32 (!%p168_p2), %v283_v37, %v285_v36 }
   0xb   : > { %v806_v14 = vld [vmem:[%s989_s1 + $0x18] sm:$0xff] (!%p168_p2)   ;;  %v810_v18 = vld [vmem:[%s989_s1 + $0x20] sm:$0xff] (!%p168_p2)   ;;  %v814_v22 = vld [vmem:[%s989_s1 + $0x28] sm:$0xff] (!%p168_p2)  }
   0xc   : > { %742 = vmatpush3.bf16.msra.mxu0 (!%p168_p2), %v798_v6  ;;  %v807_v15 = vld [vmem:[%s989_s1 + $0x98] sm:$0xff] (!%p168_p2)   ;;  %v811_v19 = vld [vmem:[%s989_s1 + $0xa0] sm:$0xff] (!%p168_p2)   ;;  %v815_v23 = vld [vmem:[%s989_s1 + $0xa8] sm:$0xff] (!%p168_p2)  }
   0xd   : > { %764 = vmatpush3.bf16.msra.mxu1 %v799_v7  ;;  %743 = vmatprep.subr.bf16.mxu0 %v800_v8  ;;  %s994_s16 = smov (!%p198_p3, %s696_s16), 1  ;;  %v816_v24 = vld [vmem:[%s989_s1 + $0x70] sm:$0xff]   ;;  %v820_v28 = vld [vmem:[%s989_s1 + $0x78] sm:$0xff]  }
   0xe   : > { %765 = vmatprep.subr.bf16.mxu1 %v801_v9  ;;  %v817_v25 = vld [vmem:[%s989_s1 + $0xf0] sm:$0xff]   ;;  %s738_s23 = sshll.u32 %s994_s16, 3  ;;  %v821_v29 = vld [vmem:[%s989_s1 + $0xf8] sm:$0xff]   ;;  %s703_s11 = sshll.u32 %s994_s16, 1 }
   0xf   : > { %v818_v26 = vld [vmem:[%s989_s1 + $0x30] sm:$0xff]   ;;  %s202_s6 = scalar_lea.vmem %s988_s0, %s738_s23  ;;  %v822_v31 = vld [vmem:[%s989_s1 + $0x38] sm:$0xff]   ;;  %s206_s14 = scalar_lea.vmem %s990_s2, %s703_s11 }
  0x10   : > { %744 = vmatpush3.bf16.msra.mxu0 %v802_v10  ;;  %v819_v27 = vld [vmem:[%s989_s1 + $0xb0] sm:$0xff]   ;;  %v823_v32 = vld [vmem:[%s989_s1 + $0xb8] sm:$0xff]   ;;  %v214_v33 = vld [vmem:[%s202_s6] sm:$0xff]  ;;  %s209_s19 = scalar_lea.vmem %s991_s3, %s994_s16  ;;  %s212_s22 = scalar_lea.vmem %s992_s4, %s994_s16 }
  0x11   : > { %766 = vmatpush3.bf16.msra.mxu1 %v803_v11  ;;  %745 = vmatprep.subr.bf16.mxu0 %v804_v12  ;;  %v280_v38 = vcombine.high %v214_v33, %v214_v33  ;;  %v287_v40 = vrot.slane %v214_v33, %v286_v39 }
  0x12   : > { %767 = vmatprep.subr.bf16.mxu1 %v805_v13 }
  0x13   : > { %v294_v41 = vrot.slane %v280_v38, %v286_v39  ;;  %v295_v42 = vcombine.high %v287_v40, %v287_v40 }
  0x14   : > { %746 = vmatpush3.bf16.msra.mxu0 %v806_v14 }
  0x15   : > { %768 = vmatpush3.bf16.msra.mxu1 %v807_v15  ;;  %747 = vmatprep.subr.bf16.mxu0 %v808_v16  ;;  %v296_v43 = vcombine.high %v294_v41, %v294_v41 }
  0x16   : > { %769 = vmatprep.subr.bf16.mxu1 %v809_v17  ;;  %525 = vmatprep.mubr.bf16.mxu0 %v295_v42 }
  0x17   : > { %565 = vmatprep.mubr.bf16.mxu1 %v296_v43 }
  0x18   : > { %748 = vmatpush3.bf16.msra.mxu0 %v810_v18 }
  0x19   : > { %770 = vmatpush3.bf16.msra.mxu1 %v811_v19  ;;  %749 = vmatprep.subr.bf16.mxu0 %v812_v20 }
  0x1a   : > { %771 = vmatprep.subr.bf16.mxu1 %v813_v21 }
  0x1c   : > { %750 = vmatpush3.bf16.msra.mxu0 %v814_v22 }
  0x1d   : > { %772 = vmatpush3.bf16.msra.mxu1 %v815_v23  ;;  %751 = vmatprep.subr.bf16.mxu0 %v816_v24 }
  0x1e   : > { %773 = vmatprep.subr.bf16.mxu1 %v817_v25 }
  0x20   : > { %752 = vmatpush3.bf16.msra.mxu0 %v818_v26 }
  0x21   : > { %774 = vmatpush3.bf16.msra.mxu1 %v819_v27  ;;  %753 = vmatprep.subr.bf16.mxu0 %v820_v28 }
  0x22   : > { %775 = vmatprep.subr.bf16.mxu1 %v821_v29 }
  0x24   : > { %754 = vmatpush3.bf16.msra.mxu0 %v822_v31 }
  0x25   : > { %776 = vmatpush3.bf16.msra.mxu1 %v823_v32 }
  0x27   : > { %526 = vmatmul.mubr.bf16.vlgmr.msra.gmra.mrb[0].mxu0 %v287_v40 }
  0x28   : > { %566 = vmatmul.mubr.bf16.vlgmr.msra.gmra.mrb[0].mxu1 %v294_v41 }
  0xfa   : > { %v755_v44 = vpop.f32.mrb[0].mxu0 }
  0xfb   : > { %v777_v45 = vpop.f32.mrb[0].mxu1  ;;  %v756_v46 = vpop.f32.mrb[1].mxu0 }
  0xfc   : > { %v778_v47 = vpop.f32.mrb[1].mxu1  ;;  %v757_v48 = vadd.f32 %v756_v46, %v755_v44  ;;  %v758_v50 = vpop.f32.mrb[2].mxu0 }
  0xfd   : > { %v779_v49 = vadd.f32 %v778_v47, %v777_v45  ;;  %v780_v51 = vpop.f32.mrb[2].mxu1  ;;  %v759_v52 = vpop.f32.mrb[3].mxu0 }
  0xfe   : > { %v781_v53 = vpop.f32.mrb[3].mxu1 }
  0xff   : > { %v568_v54 = vadd.f32 %v779_v49, %v757_v48 }
 0x101   : > { %v573_v55 = vpack.c.bf16 %v568_v54, %v568_v54  ;;  %v576_v56 = vsel %vm575_vm0, %v568_v54, 0.0  ;;  %v584_v57 = vmul.f32 %v568_v54, %v568_v54 }
 0x102   : > { %v577_v58 = vrot.slane %v576_v56, 4 }
 0x103   : > { %574 = vst [vmem:[%s206_s14] sm:$0x3] %v573_v55  ;;  %v585_v59 = vsel %vm575_vm0, %v584_v57, 0.0 }
 0x104   : > { %v578_v60 = vadd.f32 %v577_v58, %v576_v56  ;;  %v586_v61 = vrot.slane %v585_v59, 4 }
 0x106   : > { %v579_v62 = vrot.slane %v578_v60, 2  ;;  %v587_v63 = vadd.f32 %v586_v61, %v585_v59 }
 0x108   : > { %v580_v0 = vadd.f32 %v579_v62, %v578_v60  ;;  %v588_v1 = vrot.slane %v587_v63, 2 }
 0x10a   : > { %v581_v2 = vrot.slane %v580_v0, 1  ;;  %v589_v3 = vadd.f32 %v588_v1, %v587_v63 }
 0x10c   : > { %v582_v4 = vadd.f32 %v581_v2, %v580_v0  ;;  %v590_v5 = vrot.slane %v589_v3, 1 }
 0x10e   : > { %583 = vst [vmem:[%s209_s19] sm:$0x1] %v582_v4  ;;  %v591_v6 = vadd.f32 %v590_v5, %v589_v3 }
 0x110   : > { %592 = vst [vmem:[%s212_s22] sm:$0x1] %v591_v6 }
 0x111 PF: > { %s15_s15 = sadd.s32 1, %s831_s15  }
 0x112   : > { %p12_p4 = scmp.ge.s32.totalorder %s15_s15, 4  }
 0x114   :  { %14 = sbr.rel (!%p12_p4) target bundleno = 1 (0x1), region = 82 }

</bundles_post_ra>
